<compile_context>
chip_gen: v6e
topology: v6e:2x2x1
jax: 0.10.0
libtpu: 0.0.40
codegen_flags: <defaults>
</compile_context>

<pallas_src>
import functools

import jax
import jax.numpy as jnp
from jax import lax
from jax.experimental import pallas as pl
from jax.experimental.pallas import tpu as pltpu

_MIB = 1024 * 1024


# --------------------------------------------------------------------------
# Kernels
# --------------------------------------------------------------------------
def _se_fused_kernel(x_ref, w1t_ref, b1_ref, w2t_ref, b2_ref, o_ref, *,
                     inv_hw, hw_chunk):
    """Single-pass SE: squeeze + MLP + excite for a (TB, C, HW_pad) block."""
    tb, c, hw = x_ref.shape
    n_chunks = hw // hw_chunk

    # ---- squeeze: chunked, f32-accumulated sum over the lane (HW) axis ----
    def body(i, acc):
        off = pl.multiple_of(i * hw_chunk, 128)
        blk = x_ref[:, :, pl.ds(off, hw_chunk)]
        return acc + jnp.sum(blk.astype(jnp.float32), axis=-1)

    y = lax.fori_loop(0, n_chunks, body, jnp.zeros((tb, c), jnp.float32),
                      unroll=True)
    y = y * inv_hw                                                    # (TB, C)

    # ---- excitation MLP: Linear -> ReLU -> Linear -> Sigmoid (tiny path) ----
    h = jnp.dot(y, w1t_ref[...], preferred_element_type=jnp.float32) + b1_ref[...]
    h = jnp.maximum(h, 0.0)                                           # (TB, hidden)
    s = jnp.dot(h, w2t_ref[...], preferred_element_type=jnp.float32) + b2_ref[...]
    s = jax.nn.sigmoid(s)                                             # (TB, C) f32

    # ---- excite: re-read x from VMEM (block not held live across the MLP),
    # multiply in f32, cast once at the store ----
    o_ref[...] = (x_ref[...] * s[:, :, None]).astype(o_ref.dtype)


def _se_scale_kernel(x_ref, w1t_ref, b1_ref, w2t_ref, b2_ref, s_ref, acc_ref,
                     *, inv_hw):
    """Fallback pass 1: accumulate channel sums over HW chunks, finish with MLP."""
    hwi = pl.program_id(1)

    @pl.when(hwi == 0)
    def _():
        acc_ref[...] = jnp.zeros_like(acc_ref)

    acc_ref[...] += jnp.sum(x_ref[...].astype(jnp.float32), axis=-1)  # (1, C)

    @pl.when(hwi == pl.num_programs(1) - 1)
    def _():
        y = acc_ref[...] * inv_hw                                     # (1, C)
        h = jnp.dot(y, w1t_ref[...], preferred_element_type=jnp.float32) + b1_ref[...]
        h = jnp.maximum(h, 0.0)
        s = jnp.dot(h, w2t_ref[...], preferred_element_type=jnp.float32) + b2_ref[...]
        s_ref[...] = jax.nn.sigmoid(s)[:, None, :]                    # (1, 1, C)


def _se_excite_kernel(x_ref, s_ref, o_ref):
    """Fallback pass 2: rescale one (1, C, HW_CHUNK) slab by its (1, C, 1) scale."""
    o_ref[...] = (x_ref[...] * s_ref[...]).astype(o_ref.dtype)


# --------------------------------------------------------------------------
# Wrapper
# --------------------------------------------------------------------------
def _vmem_capacity_bytes():
    try:
        return int(pltpu.get_tpu_info().vmem_capacity_bytes)
    except Exception:
        return 64 * _MIB  # conservative (v7x-sized) fallback


def _pick_block_batch(B, bytes_per_batch_elem, vmem_block_budget,
                      prefer_min_steps=4):
    """Largest divisor of B whose double-buffered in+out blocks fit the budget,
    preferring >= prefer_min_steps grid steps (>=2 per TC on v7x megacore)."""
    divisors = [d for d in range(1, B + 1) if B % d == 0]
    fitting = [d for d in divisors if 4 * d * bytes_per_batch_elem <= vmem_block_budget]
    if not fitting:
        return 1
    tb = max(fitting)
    if B // tb < prefer_min_steps:
        cands = [d for d in fitting if B // d >= prefer_min_steps]
        if cands:
            tb = max(cands)
    return tb


def _largest_chunk(hw_pad):
    for c in (2048, 1024, 512, 256, 128):
        if hw_pad % c == 0:
            return c
    return hw_pad  # unreachable: hw_pad is always a multiple of 128


def se_layer(x, w1, b1, w2, b2, *, donate_input=False, block_budget_bytes=None):
    """x: (B, C, H, W).  w1: (C//r, C), b1: (C//r,), w2: (C, C//r), b2: (C,)."""
    B, C, H, W = x.shape
    hidden = w1.shape[0]
    HW = H * W
    inv_hw = 1.0 / float(HW)   # true mean, independent of any zero padding
    itemsize = x.dtype.itemsize

    # Lane-dense layout: free contiguous reshape; zero-pad HW to a multiple
    # of 128 so every store is an unmasked full-width vst.
    x3 = x.reshape(B, C, HW)
    HW_pad = ((HW + 127) // 128) * 128
    if HW_pad != HW:
        x3 = jnp.pad(x3, ((0, 0), (0, 0), (0, HW_pad - HW)))

    # Weight glue: pre-transpose; biases as 2-D rows.
    w1t = jnp.transpose(w1)            # (C, hidden)
    w2t = jnp.transpose(w2)            # (hidden, C)
    b1r = b1.reshape(1, hidden)
    b2r = b2.reshape(1, C)

    # ---- generation-aware VMEM sizing ----
    cap = _vmem_capacity_bytes()                       # 128 MiB v5e/v6e, 64 MiB v7x
    vmem_limit = min(100 * _MIB, (3 * cap) // 4)       # ~96 MiB / ~48 MiB
    weight_bytes = 2 * (w1t.size * w1t.dtype.itemsize + w2t.size * w2t.dtype.itemsize
                        + b1r.size * b1r.dtype.itemsize + b2r.size * b2r.dtype.itemsize)
    if block_budget_bytes is None:
        block_budget_bytes = max(2 * _MIB, vmem_limit // 2 - weight_bytes - 2 * _MIB)

    bytes_per_b = C * HW_pad * itemsize
    fits_fused = 4 * bytes_per_b <= block_budget_bytes   # 2x in + 2x out buffers

    if fits_fused:
        # -------- single-pass fused path --------
        TB = _pick_block_batch(B, bytes_per_b, block_budget_bytes, prefer_min_steps=4)
        hw_chunk = _largest_chunk(HW_pad)
        kernel = functools.partial(_se_fused_kernel, inv_hw=inv_hw, hw_chunk=hw_chunk)

        cost = pl.CostEstimate(
            flops=2 * B * C * HW + 4 * B * C * hidden,
            transcendentals=B * C,
            bytes_accessed=2 * B * C * HW * itemsize + 2 * C * hidden * 4,
        )

        out3 = pl.pallas_call(
            kernel,
            out_shape=jax.ShapeDtypeStruct((B, C, HW_pad), x.dtype),
            grid_spec=pltpu.PrefetchScalarGridSpec(
                num_scalar_prefetch=0,
                grid=(B // TB,),
                in_specs=[
                    pl.BlockSpec((TB, C, HW_pad), lambda b: (b, 0, 0)),
                    pl.BlockSpec((C, hidden), lambda b: (0, 0)),
                    pl.BlockSpec((1, hidden), lambda b: (0, 0)),
                    pl.BlockSpec((hidden, C), lambda b: (0, 0)),
                    pl.BlockSpec((1, C), lambda b: (0, 0)),
                ],
                out_specs=pl.BlockSpec((TB, C, HW_pad), lambda b: (b, 0, 0)),
            ),
            compiler_params=pltpu.CompilerParams(
                dimension_semantics=("parallel",),
                vmem_limit_bytes=int(vmem_limit),
            ),
            cost_estimate=cost,
            input_output_aliases=({0: 0} if donate_input else {}),
        )(x3, w1t, b1r, w2t, b2r)
    else:
        # -------- fallback: two-pass, HW-tiled (large C*HW, e.g. on v7x) --------
        max_chunk = (block_budget_bytes // max(1, 4 * C * itemsize)) // 128 * 128
        hw_chunk = int(max(128, min(max_chunk if max_chunk > 0 else 128, HW_pad)))
        HW_pad2 = ((HW_pad + hw_chunk - 1) // hw_chunk) * hw_chunk
        if HW_pad2 != HW_pad:
            x3 = jnp.pad(x3, ((0, 0), (0, 0), (0, HW_pad2 - HW_pad)))
        n_hw = HW_pad2 // hw_chunk

        scale_kernel = functools.partial(_se_scale_kernel, inv_hw=inv_hw)
        s = pl.pallas_call(
            scale_kernel,
            out_shape=jax.ShapeDtypeStruct((B, 1, C), jnp.float32),
            grid_spec=pltpu.PrefetchScalarGridSpec(
                num_scalar_prefetch=0,
                grid=(B, n_hw),
                in_specs=[
                    pl.BlockSpec((1, C, hw_chunk), lambda b, h: (b, 0, h)),
                    pl.BlockSpec((C, hidden), lambda b, h: (0, 0)),
                    pl.BlockSpec((1, hidden), lambda b, h: (0, 0)),
                    pl.BlockSpec((hidden, C), lambda b, h: (0, 0)),
                    pl.BlockSpec((1, C), lambda b, h: (0, 0)),
                ],
                out_specs=pl.BlockSpec((1, 1, C), lambda b, h: (b, 0, 0)),
                scratch_shapes=[pltpu.VMEM((1, C), jnp.float32)],
            ),
            compiler_params=pltpu.CompilerParams(
                dimension_semantics=("parallel", "arbitrary"),
                vmem_limit_bytes=int(vmem_limit),
            ),
            cost_estimate=pl.CostEstimate(
                flops=B * C * HW, transcendentals=B * C,
                bytes_accessed=B * C * HW * itemsize),
        )(x3, w1t, b1r, w2t, b2r)

        # Free (tiny) layout glue: (B, 1, C) -> (B, C, 1) so the excite kernel
        # broadcasts the scale over lanes without any in-kernel relayout.
        s3 = s.reshape(B, C, 1)

        out3 = pl.pallas_call(
            _se_excite_kernel,
            out_shape=jax.ShapeDtypeStruct((B, C, HW_pad2), x.dtype),
            grid_spec=pltpu.PrefetchScalarGridSpec(
                num_scalar_prefetch=0,
                grid=(B, n_hw),
                in_specs=[
                    pl.BlockSpec((1, C, hw_chunk), lambda b, h: (b, 0, h)),
                    pl.BlockSpec((1, C, 1), lambda b, h: (b, 0, 0)),
                ],
                out_specs=pl.BlockSpec((1, C, hw_chunk), lambda b, h: (b, 0, h)),
            ),
            compiler_params=pltpu.CompilerParams(
                dimension_semantics=("parallel", "parallel"),
                vmem_limit_bytes=int(vmem_limit),
            ),
            cost_estimate=pl.CostEstimate(
                flops=B * C * HW, transcendentals=0,
                bytes_accessed=2 * B * C * HW * itemsize),
            input_output_aliases=({0: 0} if donate_input else {}),
        )(x3, s3)

    if out3.shape[-1] != HW:
        out3 = out3[:, :, :HW]
    return out3.reshape(B, C, H, W)


def se_layer_ref(x, w1, b1, w2, b2):
    """Pure-JAX reference matching the PyTorch forward."""
    y = jnp.mean(x, axis=(2, 3))                      # (B, C)
    h = jnp.maximum(y @ w1.T + b1, 0.0)               # (B, C//r)
    s = jax.nn.sigmoid(h @ w2.T + b2)                 # (B, C)
    return x * s[:, :, None, None]


if __name__ == "__main__":
    # Small shapes consistent with the module: channels divisible by
    # reduction=16, so C=32 -> hidden=2; HW=16x16.
    B, C, H, W = 2, 32, 16, 16
    reduction = 16
    hidden = C // reduction

    key = jax.random.PRNGKey(0)
    kx, k1, k2, k3, k4 = jax.random.split(key, 5)

    x = jax.random.normal(kx, (B, C, H, W), dtype=jnp.float32)

    # Deterministic parameter init (PyTorch-Linear-style uniform bounds).
    bound1 = 1.0 / jnp.sqrt(jnp.float32(C))
    bound2 = 1.0 / jnp.sqrt(jnp.float32(hidden))
    w1 = jax.random.uniform(k1, (hidden, C), jnp.float32, -bound1, bound1)
    b1 = jax.random.uniform(k2, (hidden,), jnp.float32, -bound1, bound1)
    w2 = jax.random.uniform(k3, (C, hidden), jnp.float32, -bound2, bound2)
    b2 = jax.random.uniform(k4, (C,), jnp.float32, -bound2, bound2)

    ref = se_layer_ref(x, w1, b1, w2, b2)

    # Main fused single-pass path.
    out = jax.block_until_ready(se_layer(x, w1, b1, w2, b2))
    assert out.shape == (B, C, H, W)
    assert jnp.allclose(out, ref, atol=1e-5, rtol=1e-5), "fused path mismatch"

    # Exercise the HW-tiled two-pass fallback (used when C*HW is too large for
    # the VMEM block budget, e.g. big feature maps on v7x) and verify it too.
    out_fb = jax.block_until_ready(
        se_layer(x, w1, b1, w2, b2, block_budget_bytes=1))
    assert jnp.allclose(out_fb, ref, atol=1e-5, rtol=1e-5), "fallback path mismatch"

    print("KERNEL_OK")
</pallas_src>

<mosaic_0001>
module attributes {stable_mosaic.version = 11 : i64} {
  func.func @_se_fused_kernel(%arg0: i32, %arg1: memref<2x32x256xf32, #tpu.memory_space<vmem>>, %arg2: memref<32x2xf32, #tpu.memory_space<vmem>>, %arg3: memref<1x2xf32, #tpu.memory_space<vmem>>, %arg4: memref<2x32xf32, #tpu.memory_space<vmem>>, %arg5: memref<1x32xf32, #tpu.memory_space<vmem>>, %arg6: memref<2x32x256xf32, #tpu.memory_space<vmem>>) attributes {dimension_semantics = [#tpu.dimension_semantics<parallel>], iteration_bounds = array<i64: 1>, scalar_prefetch = 0 : i64, scratch_operands = 0 : i64, tpu.core_type = #tpu.core_type<tc>, window_params = [{transform_indices = @transform_0, window_bounds = array<i64: 2, 32, 256>}, {pipeline_mode = #tpu.pipeline_mode<synchronous>, transform_indices = @transform_1, window_bounds = array<i64: 32, 2>}, {pipeline_mode = #tpu.pipeline_mode<synchronous>, transform_indices = @transform_2, window_bounds = array<i64: 1, 2>}, {pipeline_mode = #tpu.pipeline_mode<synchronous>, transform_indices = @transform_3, window_bounds = array<i64: 2, 32>}, {pipeline_mode = #tpu.pipeline_mode<synchronous>, transform_indices = @transform_4, window_bounds = array<i64: 1, 32>}, {transform_indices = @transform_5, window_bounds = array<i64: 2, 32, 256>}]} {
    %cst = arith.constant 0.000000e+00 : f32
    %0 = vector.broadcast %cst : f32 to vector<2x32xf32>
    %c0_i32 = arith.constant 0 : i32
    %c256_i32 = arith.constant 256 : i32
    %1 = arith.muli %c0_i32, %c256_i32 : i32
    %2 = tpu.assume_multiple %1, 128 : i32
    %c0 = arith.constant 0 : index
    %c0_0 = arith.constant 0 : index
    %3 = arith.index_cast %2 : i32 to index
    %4 = vector.load %arg1[%c0, %c0_0, %3] : memref<2x32x256xf32, #tpu.memory_space<vmem>>, vector<2x32x256xf32>
    %cst_1 = arith.constant dense<0.000000e+00> : vector<2x32xf32>
    %5 = vector.multi_reduction <add>, %4, %cst_1 [2] : vector<2x32x256xf32> to vector<2x32xf32>
    %6 = arith.addf %0, %5 : vector<2x32xf32>
    %c1_i32 = arith.constant 1 : i32
    %cst_2 = arith.constant 3.906250e-03 : f32
    %7 = vector.broadcast %cst_2 : f32 to vector<2x32xf32>
    %8 = arith.mulf %6, %7 : vector<2x32xf32>
    %c0_3 = arith.constant 0 : index
    %c0_4 = arith.constant 0 : index
    %9 = vector.load %arg2[%c0_3, %c0_4] : memref<32x2xf32, #tpu.memory_space<vmem>>, vector<32x2xf32>
    %cst_5 = arith.constant dense<0.000000e+00> : vector<2x2xf32>
    %10 = tpu.matmul %8, %9, %cst_5 {dimension_numbers = #tpu.dot_dimension_numbers<[1], [0], [0], [1], [0, 0, 1, 1], [], []>} : vector<2x32xf32>, vector<32x2xf32>, vector<2x2xf32> -> vector<2x2xf32>
    %c0_6 = arith.constant 0 : index
    %c0_7 = arith.constant 0 : index
    %11 = vector.load %arg3[%c0_6, %c0_7] : memref<1x2xf32, #tpu.memory_space<vmem>>, vector<1x2xf32>
    %12 = vector.broadcast %11 : vector<1x2xf32> to vector<2x2xf32>
    %13 = arith.addf %10, %12 : vector<2x2xf32>
    %cst_8 = arith.constant 0.000000e+00 : f32
    %14 = vector.broadcast %cst_8 : f32 to vector<2x2xf32>
    %15 = arith.maximumf %13, %14 : vector<2x2xf32>
    %c0_9 = arith.constant 0 : index
    %c0_10 = arith.constant 0 : index
    %16 = vector.load %arg4[%c0_9, %c0_10] : memref<2x32xf32, #tpu.memory_space<vmem>>, vector<2x32xf32>
    %cst_11 = arith.constant dense<0.000000e+00> : vector<2x32xf32>
    %17 = tpu.matmul %15, %16, %cst_11 {dimension_numbers = #tpu.dot_dimension_numbers<[1], [0], [0], [1], [0, 0, 1, 1], [], []>} : vector<2x2xf32>, vector<2x32xf32>, vector<2x32xf32> -> vector<2x32xf32>
    %c0_12 = arith.constant 0 : index
    %c0_13 = arith.constant 0 : index
    %18 = vector.load %arg5[%c0_12, %c0_13] : memref<1x32xf32, #tpu.memory_space<vmem>>, vector<1x32xf32>
    %19 = vector.broadcast %18 : vector<1x32xf32> to vector<2x32xf32>
    %20 = arith.addf %17, %19 : vector<2x32xf32>
    %21 = arith.negf %20 : vector<2x32xf32>
    %22 = math.exp %21 : vector<2x32xf32>
    %cst_14 = arith.constant 1.000000e+00 : f32
    %23 = vector.broadcast %cst_14 : f32 to vector<2x32xf32>
    %24 = arith.addf %23, %22 : vector<2x32xf32>
    %25 = arith.divf %23, %24 : vector<2x32xf32>
    %c0_15 = arith.constant 0 : index
    %c0_16 = arith.constant 0 : index
    %c0_17 = arith.constant 0 : index
    %26 = vector.load %arg1[%c0_15, %c0_16, %c0_17] : memref<2x32x256xf32, #tpu.memory_space<vmem>>, vector<2x32x256xf32>
    %27 = vector.shape_cast %25 : vector<2x32xf32> to vector<2x32x1xf32>
    %28 = vector.broadcast %27 : vector<2x32x1xf32> to vector<2x32x256xf32>
    %29 = arith.mulf %26, %28 : vector<2x32x256xf32>
    %c0_18 = arith.constant 0 : index
    %c0_19 = arith.constant 0 : index
    %c0_20 = arith.constant 0 : index
    %30 = vector.load %arg6[%c0_18, %c0_19, %c0_20] : memref<2x32x256xf32, #tpu.memory_space<vmem>>, vector<2x32x256xf32>
    tpu.vector_store %arg6[%c0_18, %c0_19, %c0_20], %29 {strides = array<i32>} : memref<2x32x256xf32, #tpu.memory_space<vmem>>, vector<2x32x256xf32>,
    return
  }
  func.func @transform_0(%arg0: i32) -> (i32, i32, i32) {
    %c0_i32 = arith.constant 0 : i32
    %c0_i32_0 = arith.constant 0 : i32
    %c0_i32_1 = arith.constant 0 : i32
    return %arg0, %c0_i32, %c0_i32_0 : i32, i32, i32
  }
  func.func @transform_1(%arg0: i32) -> (i32, i32) {
    %c0_i32 = arith.constant 0 : i32
    %c0_i32_0 = arith.constant 0 : i32
    %c0_i32_1 = arith.constant 0 : i32
    return %c0_i32, %c0_i32_0 : i32, i32
  }
  func.func @transform_2(%arg0: i32) -> (i32, i32) {
    %c0_i32 = arith.constant 0 : i32
    %c0_i32_0 = arith.constant 0 : i32
    %c0_i32_1 = arith.constant 0 : i32
    return %c0_i32, %c0_i32_0 : i32, i32
  }
  func.func @transform_3(%arg0: i32) -> (i32, i32) {
    %c0_i32 = arith.constant 0 : i32
    %c0_i32_0 = arith.constant 0 : i32
    %c0_i32_1 = arith.constant 0 : i32
    return %c0_i32, %c0_i32_0 : i32, i32
  }
  func.func @transform_4(%arg0: i32) -> (i32, i32) {
    %c0_i32 = arith.constant 0 : i32
    %c0_i32_0 = arith.constant 0 : i32
    %c0_i32_1 = arith.constant 0 : i32
    return %c0_i32, %c0_i32_0 : i32, i32
  }
  func.func @transform_5(%arg0: i32) -> (i32, i32, i32) {
    %c0_i32 = arith.constant 0 : i32
    %c0_i32_0 = arith.constant 0 : i32
    %c0_i32_1 = arith.constant 0 : i32
    return %arg0, %c0_i32, %c0_i32_0 : i32, i32, i32
  }
}

</mosaic_0001>

<bundles_post_ra>
// kernel: tpu_custom_call.1
= control target key start
LH: loop header
LB: loop body
LE: loop exit
PB: predicated region body
PF: predicated region fallthrough
CT: control target
= control target key end

     0   :  { %10 = vsyncpa [#allocation3], 0  ;;  %s651_s0 = inlined_call_operand.hbm [shape: f32[2,32,256], index: 0, kind: input, shape index: {}]   ;;  %s652_s1 = inlined_call_operand.vmem [shape: f32[32,2], index: 1, kind: input, shape index: {}]   ;;  %s653_s2 = inlined_call_operand.vmem [shape: f32[1,2], index: 2, kind: input, shape index: {}]   ;;  %s654_s3 = inlined_call_operand.vmem [shape: f32[2,32], index: 3, kind: input, shape index: {}]   ;;  %s655_s4 = inlined_call_operand.vmem [shape: f32[1,32], index: 4, kind: input, shape index: {}]   ;;  %s656_s5 = inlined_call_operand.hbm [shape: f32[2,32,256], index: 5, kind: output, shape index: {}]  }
   0x1   :  { %11 = vsyncpa [#allocation4], 0  ;;  %s510_s18 = smov [#allocation2]  }
   0x2   :  { %s17_s19 = sshll.u32 %s510_s18, 4  ;;  %s18_s19 = int_to_ptr.vmem [resolvable:$true] %s17_s19 }
   0x3   :  { %s474_s20 = scalar_lea.vmem %s18_s19, 2048  ;;  %p479_p1 = scmp.lt.s32.totalorder %s18_s19, %s18_s19 }
   0x4   :  { %p475_p0 = scmp.ne.s32.totalorder %s18_s19, %s474_s20  ;;  %p480_p2 = scmp.lt.s32.totalorder %s474_s20, %s474_s20 }
   0x6   :  { %p481_p3 = por %p480_p2, %p479_p1 }
   0x8   :  { %p482_p4 = pnand %p481_p3, %p475_p0 }
   0xa   :  { %485 = shalt.err (!%p482_p4)
}
   0xb   :  { %s511_s21 = smov 256   ;;  %s512_s22 = smov 16  }
   0xc   :  { %23 = dma.hbm_to_vmem [thread:$0]  %s651_s0, 2048, %s18_s19, [#allocation3], %s511_s21, %s511_s21, %s512_s22  }
   0xd   :  { %506 = dma.done.wait [#allocation3], 2048  }
   0xe   :  { %507 = vsyncadd [#allocation3], 4294965248  ;;  %v552_v0 = vld [vmem:[#allocation2 + $0x40] sm:$0xff]  ;;  %v554_v1 = vld [vmem:[#allocation2 + $0x48] sm:$0xff]  ;;  %v513_v24 = vmov 0.0   ;;  %vm514_vm0 = vmmov 0   ;;  %v110_v29 = vlaneseq }
   0xf   :  { %v556_v2 = vld [vmem:[#allocation2] sm:$0xff]  ;;  %v63_v3 = vadd.f32 %v554_v1, %v552_v0  ;;  %v560_v4 = vld [vmem:[#allocation2 + $0x8] sm:$0xff]  ;;  %v562_v5 = vld [vmem:[#allocation2 + $0x50] sm:$0xff]  ;;  %440 = vmatprep.subr.mxu0 %v513_v24  ;;  %451 = vmatprep.subr.mxu1 %v513_v24  ;;  %vm121_vm1 = vcmask 130112   ;;  %vm128_vm2 = vcmask 195712   ;;  %vm135_vm3 = vcmask 261312  }
  0x10   :  { %v564_v6 = vld [vmem:[#allocation2 + $0x58] sm:$0xff]  ;;  %v51_v7 = vadd.f32 %v560_v4, %v556_v2  ;;  %v568_v8 = vld [vmem:[#allocation2 + $0x10] sm:$0xff]  ;;  %v576_v12 = vld [vmem:[#allocation2 + $0x60] sm:$0xff]  ;;  %448 = vmatprep.mubr.msk.f32.mxu0 %vm514_vm0, %v513_v24  ;;  %453 = vmatprep.mubr.msk.f32.mxu1 %vm514_vm0, %v513_v24  ;;  %v111_v31 = vand.u32 127, %v110_v29  ;;  %v612_v36 = vshrl.u32 %v110_v29, 7  ;;  %vm156_vm4 = vcmask 1041409  }
  0x11   :  { %v570_v9 = vld [vmem:[#allocation2 + $0x18] sm:$0xff]  ;;  %64 = vadd.xlane.f32.xlu1 %v63_v3  ;;  %v66_v10 = vadd.f32 %v564_v6, %v562_v5  ;;  %v578_v13 = vld [vmem:[#allocation2 + $0x68] sm:$0xff]  ;;  %v580_v14 = vld [vmem:[#allocation2 + $0x20] sm:$0xff]  ;;  %vm158_vm5 = vcmask 261120   ;;  %vm244_vm6 = vcmask 1041408   ;;  %vm240_vm7 = vcmask 15360  }
  0x12   :  { %52 = vadd.xlane.f32.xlu0 %v51_v7  ;;  %v54_v11 = vadd.f32 %v570_v9, %v568_v8  ;;  %v582_v15 = vld [vmem:[#allocation2 + $0x28] sm:$0xff]  ;;  %v69_v16 = vadd.f32 %v578_v13, %v576_v12  ;;  %v588_v18 = vld [vmem:[#allocation2 + $0x70] sm:$0xff]  ;;  %v590_v19 = vld [vmem:[#allocation2 + $0x78] sm:$0xff]  ;;  %v116_v33 = vadd.s32 4294967288, %v111_v31  ;;  %v123_v35 = vadd.s32 4294967280, %v111_v31 }
  0x13   :  { %v57_v17 = vadd.f32 %v582_v15, %v580_v14  ;;  %v592_v20 = vld [vmem:[#allocation2 + $0x30] sm:$0xff]  ;;  %v594_v21 = vld [vmem:[#allocation2 + $0x38] sm:$0xff]  ;;  %v72_v22 = vadd.f32 %v590_v19, %v588_v18  ;;  %v92_v27 = vld [vmem:[%s652_s1 + $0x8] sm:$0xff]  ;;  %v130_v40 = vadd.s32 4294967272, %v111_v31  ;;  %v114_v44 = vsub.s32 %v111_v31, %v612_v36 }
  0x14   :  { %v60_v23 = vadd.f32 %v594_v21, %v592_v20  ;;  %v94_v25 = vld [vmem:[%s652_s1 + $0x18] sm:$0xff]  ;;  %v93_v26 = vld [vmem:[%s652_s1 + $0x10] sm:$0xff]  ;;  %v91_v28 = vld [vmem:[%s652_s1] sm:$0xff]  ;;  %v119_v38 = vsub.s32 %v116_v33, %v612_v36  ;;  %v126_v42 = vsub.s32 %v123_v35, %v612_v36  ;;  %v342_v35 = vsub.s32 0, %v612_v36 }
  0x15   :  { %67 = vadd.xlane.f32.xlu1 %v66_v10  ;;  %441 = vmatpush3.msra.mxu0 %v94_v25  ;;  %v133_v51 = vsub.s32 %v130_v40, %v612_v36 }
  0x16   :  { %55 = vadd.xlane.f32.xlu0 %v54_v11  ;;  %442 = vmatprep.subr.mxu0 %v513_v24 }
  0x17   :  { %443 = vmatpush3.msra.mxu0 %v93_v26 }
  0x18   :  { %444 = vmatprep.subr.mxu0 %v513_v24 }
  0x19   :  { %70 = vadd.xlane.f32.xlu1 %v69_v16  ;;  %445 = vmatpush3.msra.mxu0 %v92_v27 }
  0x1a   :  { %58 = vadd.xlane.f32.xlu0 %v57_v17  ;;  %446 = vmatprep.subr.mxu0 %v513_v24 }
  0x1b   :  { %447 = vmatpush3.msra.mxu0 %v91_v28  ;;  %v429_v28 = vld [vmem:[%s655_s4] ss:$0 sm:$0xff] }
  0x1d   :  { %73 = vadd.xlane.f32.xlu1 %v72_v22  ;;  %v232_v22 = vld [vmem:[%s654_s3] sm:$0x3] }
  0x1e   :  { %61 = vadd.xlane.f32.xlu0 %v60_v23  ;;  %452 = vmatpush3.msk.msra.mxu1 %vm244_vm6, %v232_v22  ;;  %v427_v23 = vld [vmem:[%s653_s2] ss:$0 sm:$0xff]  ;;  %s515_s2 = smov [#allocation5]  }
  0x1f   :  { %s415_s3 = sshll.u32 %s515_s2, 4  ;;  %s416_s3 = int_to_ptr.vmem [resolvable:$true] %s415_s3 }
  0x20   :  { %s486_s4 = scalar_lea.vmem %s416_s3, 2048  ;;  %p491_p6 = scmp.lt.s32.totalorder %s416_s3, %s416_s3 }
  0x21   :  { %p487_p5 = scmp.ne.s32.totalorder %s416_s3, %s486_s4  ;;  %p492_p7 = scmp.lt.s32.totalorder %s486_s4, %s486_s4 }
  0x23   :  { %p493_p8 = por %p492_p7, %p491_p6 }
  0x25   :  { %p494_p9 = pnand %p493_p8, %p487_p5 }
  0x9a   :  { %v65_v30 = vpop.xlane.xlu1 %64 }
  0x9b   :  { %v53_v32 = vpop.xlane.xlu0 %52  ;;  %v87_v45 = vmul.f32 0.00390625, %v65_v30 }
  0x9c   :  { %v83_v48 = vmul.f32 0.00390625, %v53_v32 }
  0x9d   :  { %v140_v55 = vrot.slane %v87_v45, %v114_v44 }
  0x9e   :  { %v68_v34 = vpop.xlane.xlu1 %67  ;;  %v115_v59 = vrot.slane %v83_v48, %v114_v44 }
  0x9f   :  { %v56_v37 = vpop.xlane.xlu0 %55  ;;  %v88_v39 = vmul.f32 0.00390625, %v68_v34 }
  0xa0   :  { %v84_v41 = vmul.f32 0.00390625, %v56_v37 }
  0xa1   :  { %v144_v50 = vrot.slane %v88_v39, %v119_v38  ;;  %v361_v39 = vsub.s32 1, %v612_v36 }
  0xa2   :  { %v71_v43 = vpop.xlane.xlu1 %70  ;;  %v120_v52 = vrot.slane %v84_v41, %v119_v38 }
  0xa3   :  { %v89_v46 = vmul.f32 0.00390625, %v71_v43  ;;  %v59_v47 = vpop.xlane.xlu0 %58  ;;  %v145_v61 = vsel %vm121_vm1, %v144_v50, %v140_v55 }
  0xa4   :  { %v85_v49 = vmul.f32 0.00390625, %v59_v47  ;;  %v122_v63 = vsel %vm121_vm1, %v120_v52, %v115_v59 }
  0xa5   :  { %v149_v53 = vrot.slane %v89_v46, %v126_v42 }
  0xa6   :  { %v74_v54 = vpop.xlane.xlu1 %73  ;;  %v127_v56 = vrot.slane %v85_v49, %v126_v42 }
  0xa7   :  { %v90_v57 = vmul.f32 0.00390625, %v74_v54  ;;  %v62_v58 = vpop.xlane.xlu0 %61  ;;  %v150_v3 = vsel %vm128_vm2, %v149_v53, %v145_v61 }
  0xa8   :  { %v86_v60 = vmul.f32 0.00390625, %v62_v58  ;;  %v129_v10 = vsel %vm128_vm2, %v127_v56, %v122_v63 }
  0xa9   :  { %v154_v62 = vrot.slane %v90_v57, %v133_v51 }
  0xaa   :  { %v134_v7 = vrot.slane %v86_v60, %v133_v51 }
  0xab   :  { %v155_v11 = vsel %vm135_vm3, %v154_v62, %v150_v3 }
  0xac   :  { %v136_v16 = vsel %vm135_vm3, %v134_v7, %v129_v10 }
  0xad   :  { %v157_v17 = vsel %vm156_vm4, %v155_v11, %v136_v16 }
  0xae   :  { %449 = vmatmul.mubr.msk.f32.vlgmr.msra.gmra.mxu0 %vm158_vm5, %v157_v17 }
 0x16e   :  { %v227_v24 = vpop.f32.mrf.mxu0 }
 0x16f   :  { %v228_v25 = vadd.f32 %v427_v23, %v227_v24 }
 0x170   :  { %v450_v26 = vpop.f32.mrf.mxu0 }
 0x171   :  { %v231_v27 = vmax.f32 %v228_v25, 0.0 }
 0x173   :  { %454 = vmatmul.mubr.msk.f32.vlgmr.msra.gmra.mxu1 %vm240_vm7, %v231_v27 }
 0x233   :  { %v314_v29 = vpop.f32.mrf.mxu1 }
 0x234   :  { %v315_v30 = vadd.f32 %v429_v28, %v314_v29 }
 0x235   :  { %v455_v31 = vpop.f32.mrf.mxu1 }
 0x236   :  { %v432_v32 = vmul.f32 -1.442695, %v315_v30 }
 0x238   :  { %462 = vpow2.f32 %v432_v32 }
 0x245   :  { %v463_v33 = vpop.eup %462 }
 0x246   :  { %v321_v34 = vadd.f32 1.0, %v463_v33 }
 0x248   :  { %464 = vrcp.f32 %v321_v34 }
 0x255   :  { %v465_v37 = vpop.eup %464 }
 0x256   :  { %v343_v38 = vrot.slane %v465_v37, %v342_v35  ;;  %v362_v40 = vrot.slane %v465_v37, %v361_v39 }
 0x258   :  { %349 = vbcast.lane.b32.xlu1 %v343_v38, 264  ;;  %345 = vbcast.lane.b32.xlu0 %v343_v38, 256 }
 0x25c   :  { %353 = vbcast.lane.b32.xlu1 %v343_v38, 272  ;;  %364 = vbcast.lane.b32.xlu0 %v362_v40, 256 }
 0x260   :  { %357 = vbcast.lane.b32.xlu1 %v343_v38, 280  ;;  %372 = vbcast.lane.b32.xlu0 %v362_v40, 272 }
 0x264   :  { %368 = vbcast.lane.b32.xlu1 %v362_v40, 264 }
 0x268   :  { %376 = vbcast.lane.b32.xlu1 %v362_v40, 280 }
 0x2ca   :  { %v350_v41 = vpop.permute.xlu1 %349  ;;  %v346_v42 = vpop.permute.xlu0 %345 }
 0x2cb   :  { %v380_v43 = vmul.f32 %v350_v41, %v568_v8  ;;  %v381_v44 = vmul.f32 %v350_v41, %v570_v9  ;;  %v378_v45 = vmul.f32 %v346_v42, %v556_v2  ;;  %v379_v46 = vmul.f32 %v346_v42, %v560_v4 }
 0x2cd   :  { %396 = vst [vmem:[#allocation5 + $0x10] sm:$0xff] %v380_v43  ;;  %397 = vst [vmem:[#allocation5 + $0x18] sm:$0xff] %v381_v44 }
 0x2ce   :  { %394 = vst [vmem:[#allocation5] sm:$0xff] %v378_v45  ;;  %395 = vst [vmem:[#allocation5 + $0x8] sm:$0xff] %v379_v46  ;;  %v354_v36 = vpop.permute.xlu1 %353  ;;  %v365_v47 = vpop.permute.xlu0 %364 }
 0x2cf   :  { %v382_v48 = vmul.f32 %v354_v36, %v580_v14  ;;  %v383_v49 = vmul.f32 %v354_v36, %v582_v15  ;;  %v386_v50 = vmul.f32 %v365_v47, %v552_v0  ;;  %v387_v8 = vmul.f32 %v365_v47, %v554_v1 }
 0x2d1   :  { %398 = vst [vmem:[#allocation5 + $0x20] sm:$0xff] %v382_v48  ;;  %399 = vst [vmem:[#allocation5 + $0x28] sm:$0xff] %v383_v49 }
 0x2d2   :  { %402 = vst [vmem:[#allocation5 + $0x40] sm:$0xff] %v386_v50  ;;  %403 = vst [vmem:[#allocation5 + $0x48] sm:$0xff] %v387_v8  ;;  %v358_v2 = vpop.permute.xlu1 %357  ;;  %v373_v4 = vpop.permute.xlu0 %372 }
 0x2d3   :  { %v384_v9 = vmul.f32 %v358_v2, %v592_v20  ;;  %v385_v51 = vmul.f32 %v358_v2, %v594_v21  ;;  %v390_v52 = vmul.f32 %v373_v4, %v576_v12  ;;  %v391_v14 = vmul.f32 %v373_v4, %v578_v13 }
 0x2d5   :  { %400 = vst [vmem:[#allocation5 + $0x30] sm:$0xff] %v384_v9  ;;  %401 = vst [vmem:[#allocation5 + $0x38] sm:$0xff] %v385_v51 }
 0x2d6   :  { %406 = vst [vmem:[#allocation5 + $0x60] sm:$0xff] %v390_v52  ;;  %407 = vst [vmem:[#allocation5 + $0x68] sm:$0xff] %v391_v14  ;;  %v369_v0 = vpop.permute.xlu1 %368 }
 0x2d7   :  { %v388_v1 = vmul.f32 %v369_v0, %v562_v5  ;;  %v389_v15 = vmul.f32 %v369_v0, %v564_v6 }
 0x2d9   :  { %404 = vst [vmem:[#allocation5 + $0x50] sm:$0xff] %v388_v1  ;;  %405 = vst [vmem:[#allocation5 + $0x58] sm:$0xff] %v389_v15 }
 0x2da   :  { %v377_v20 = vpop.permute.xlu1 %376 }
 0x2db   :  { %v392_v21 = vmul.f32 %v377_v20, %v588_v18  ;;  %v393_v12 = vmul.f32 %v377_v20, %v590_v19 }
 0x2dd   :  { %408 = vst [vmem:[#allocation5 + $0x70] sm:$0xff] %v392_v21  ;;  %409 = vst [vmem:[#allocation5 + $0x78] sm:$0xff] %v393_v12 }
 0x2de   :  { %497 = shalt.err (!%p494_p9)
}
 0x2df   :  { %421 = dma.vmem_to_hbm [thread:$0]  %s416_s3, 2048, %s656_s5, [#allocation4], %s511_s21, %s511_s21, %s512_s22  }
 0x2e0   :  { %508 = dma.done.wait [#allocation4], 2048  }
 0x2e1   :  { %509 = vsyncadd [#allocation4], 4294965248 }
 0x2e2   :  { %425 = vsyncpa [#allocation3], 1 }
 0x2e3   :  { %426 = vsyncpa [#allocation4], 1 }

</bundles_post_ra>
